<compile_context>
chip_gen: v6e
topology: v6e:2x2x1
jax: 0.10.0
libtpu: 0.0.40
codegen_flags: <defaults>
</compile_context>

<pallas_src>
import jax
import jax.numpy as jnp
from jax.experimental import pallas as pl
from jax.experimental.pallas import tpu as pltpu

EPS = 1e-5          # nn.BatchNorm2d default
_LANE = 128
_MIB = 1024 * 1024


def _vmem_cap_bytes():
    """Physical VMEM of the local TPU; conservative 64 MiB (v7x) fallback."""
    try:
        cap = getattr(pltpu.get_tpu_info(), "vmem_capacity_bytes", None)
        if cap:
            return max(int(cap), 48 * _MIB)
    except Exception:
        pass
    return 64 * _MIB


def _largest_divisor_leq(n, cap):
    cap = max(1, min(n, cap))
    for d in range(cap, 0, -1):
        if n % d == 0:
            return d
    return 1


def _choose_tiles(B, C, HW, itemsize, budget):
    """Pick (TB, THW).  TB divides B (no batch padding).  THW is either the
    full spatial extent HW (no tail, exempt from 128-alignment) or a multiple
    of 128 <= HW (ragged tail masked in-kernel)."""
    TB = _largest_divisor_leq(B, 8)
    min_lanes = min(HW, _LANE)
    while TB > 1 and TB * C * min_lanes * itemsize > budget:
        TB = _largest_divisor_leq(B, TB - 1)
    if TB * C * HW * itemsize <= budget or HW <= _LANE:
        # Typical conv feature maps (49, 196, 784, 3136, ...) land here.
        # TODO(synk): for pathologically large C (C*HW*itemsize >> budget with
        # HW <= 128) the block would need a C grid axis; not implemented.
        THW = HW
    else:
        max_lanes = max(_LANE, (budget // (TB * C * itemsize)) // _LANE * _LANE)
        THW = int(min(max_lanes, 4096, HW // _LANE * _LANE))
    return TB, THW


# ---------------------------------------------------------------------------
# Kernels
# ---------------------------------------------------------------------------

def _make_stats_kernel(hw, thw, ragged):
    """Per-block partial per-channel sum / sum-of-squares (f32)."""
    def kernel(x_ref, sum_ref, sumsq_ref):
        x = x_ref[...].astype(jnp.float32)                    # (TB, C, THW)
        if ragged:
            # Edge-block contents beyond HW are undefined -> zero them so the
            # statistics are exact without ever padding x in HBM.
            hi = pl.program_id(1)
            lane = jax.lax.broadcasted_iota(jnp.int32, x.shape, dimension=2)
            x = jnp.where(lane < hw - hi * thw, x, 0.0)
        sum_ref[...] = jnp.sum(x, axis=(0, 2), keepdims=True)      # (1, C, 1)
        sumsq_ref[...] = jnp.sum(x * x, axis=(0, 2), keepdims=True)
    return kernel


def _affine_kernel(x_ref, scale_ref, shift_ref, o_ref):
    """x_ref/o_ref: (TB, C, THW); scale_ref/shift_ref: (TB, C, 1) f32.
    Out-of-bounds lanes of a ragged tail block compute garbage that Pallas
    drops on writeback, so no masking is needed here."""
    o_ref[...] = (x_ref[...] * scale_ref[...] + shift_ref[...]).astype(o_ref.dtype)


def _make_fused_kernel(n_elems):
    """Whole x resident in VMEM: stats + conditional affine in one pass."""
    inv_n = 1.0 / float(n_elems)

    def kernel(x_ref, gamma_ref, beta_ref, o_ref):
        x = x_ref[...].astype(jnp.float32)                         # (B, C, HW)
        mean = jnp.sum(x, axis=(0, 2), keepdims=True) * inv_n      # (1, C, 1)
        ex2 = jnp.sum(x * x, axis=(0, 2), keepdims=True) * inv_n
        # Biased variance (training-mode BN). Clamp guards tiny negative values
        # from E[x^2]-mean^2 cancellation in f32.
        var = jnp.maximum(ex2 - mean * mean, 0.0)
        rstd = jax.lax.rsqrt(var + EPS)
        scale = gamma_ref[...] * rstd                              # (B, C, 1)
        shift = beta_ref[...] - mean * scale
        o_ref[...] = (x * scale + shift).astype(o_ref.dtype)
    return kernel


# ---------------------------------------------------------------------------
# Wrapper
# ---------------------------------------------------------------------------

def _conditional_batchnorm2d_pallas(x, gamma, beta, *, force_two_pass=False,
                                    _force_tiles=None):
    """x: (B, C, H, W); gamma/beta: (B, C). Returns (B, C, H, W) in x.dtype."""
    B, C, H, W = x.shape
    HW = H * W
    dt = x.dtype
    itemsize = dt.itemsize
    cap = _vmem_cap_bytes()

    x3 = x.reshape(B, C, HW)          # contiguous reshape: no copy

    # ---- Fused single-pass path (small/medium feature maps). --------------
    if (not force_two_pass and _force_tiles is None
            and B * C * HW * 4 <= cap // 12):
        gamma3 = gamma.astype(jnp.float32).reshape(B, C, 1)
        beta3 = beta.astype(jnp.float32).reshape(B, C, 1)
        full = pl.BlockSpec((B, C, HW), lambda i: (0, 0, 0))
        vec = pl.BlockSpec((B, C, 1), lambda i: (0, 0, 0))
        out3 = pl.pallas_call(
            _make_fused_kernel(B * HW),
            out_shape=jax.ShapeDtypeStruct((B, C, HW), dt),
            grid=(1,),
            in_specs=[full, vec, vec],
            out_specs=full,
            compiler_params=pltpu.CompilerParams(
                dimension_semantics=("arbitrary",),
                vmem_limit_bytes=int(max(32 * _MIB, cap - 16 * _MIB))),
        )(x3, gamma3, beta3)
        return out3.reshape(B, C, H, W)

    # ---- Two-pass streaming path (large activations). ----------------------
    budget = max(2 * _MIB, min(10 * _MIB, cap // 12))
    if _force_tiles is not None:
        TB, THW = _force_tiles
        assert B % TB == 0 and (THW == HW or THW % _LANE == 0)
    else:
        TB, THW = _choose_tiles(B, C, HW, itemsize, budget)

    n_b = B // TB
    n_hw = (HW + THW - 1) // THW
    ragged = (HW % THW) != 0
    n_blocks = n_b * n_hw

    tile_bytes = TB * C * THW * itemsize
    vmem_limit = int(min(max(32 * _MIB, cap - 16 * _MIB),
                         max(32 * _MIB, 7 * tile_bytes)))

    x_spec = pl.BlockSpec((TB, C, THW), lambda bi, hi: (bi, 0, hi))
    # Each grid step writes its own partial-sum block -> both axes "parallel"
    # (v7x shards the stats pass across its two TensorCores).
    part_spec = pl.BlockSpec((1, C, 1), lambda bi, hi: (bi * n_hw + hi, 0, 0))

    # Pass 1: single streaming read of x, per-block partial sums / sum-sq.
    sums, sumsqs = pl.pallas_call(
        _make_stats_kernel(HW, THW, ragged),
        out_shape=(jax.ShapeDtypeStruct((n_blocks, C, 1), jnp.float32),
                   jax.ShapeDtypeStruct((n_blocks, C, 1), jnp.float32)),
        grid=(n_b, n_hw),
        in_specs=[x_spec],
        out_specs=(part_spec, part_spec),
        compiler_params=pltpu.CompilerParams(
            dimension_semantics=("parallel", "parallel"),
            vmem_limit_bytes=vmem_limit),
    )(x3)

    # Tiny per-(B, C) math in plain JAX: reduce partials, fold BN stats +
    # conditional affine into a single scale/shift per (sample, channel).
    n = jnp.float32(B * HW)
    mean = jnp.sum(sums, axis=0).reshape(C) / n
    ex2 = jnp.sum(sumsqs, axis=0).reshape(C) / n
    var = jnp.maximum(ex2 - mean * mean, 0.0)        # biased var, clamp cancellation
    rstd = jax.lax.rsqrt(var + EPS)
    scale = gamma.astype(jnp.float32) * rstd[None, :]          # (B, C)
    shift = beta.astype(jnp.float32) - mean[None, :] * scale   # (B, C)
    scale3 = scale.reshape(B, C, 1)
    shift3 = shift.reshape(B, C, 1)

    aff_spec = pl.BlockSpec((TB, C, 1), lambda bi, hi: (bi, 0, 0))

    # Pass 2: stream x again, out = x * scale + shift (fully parallel grid).
    out3 = pl.pallas_call(
        _affine_kernel,
        out_shape=jax.ShapeDtypeStruct((B, C, HW), dt),
        grid=(n_b, n_hw),
        in_specs=[x_spec, aff_spec, aff_spec],
        out_specs=x_spec,
        compiler_params=pltpu.CompilerParams(
            dimension_semantics=("parallel", "parallel"),
            vmem_limit_bytes=vmem_limit),
    )(x3, scale3, shift3)

    return out3.reshape(B, C, H, W)


conditional_batchnorm2d_pallas = jax.jit(
    _conditional_batchnorm2d_pallas,
    static_argnames=("force_two_pass", "_force_tiles"))


# ---------------------------------------------------------------------------
# Module port
# ---------------------------------------------------------------------------

class ConditionalBatchNorm2dJAX:
    """JAX/Pallas port of the PyTorch module (forward only, training-mode BN)."""

    def __init__(self, num_features, num_classes=None, bias=True, key=None):
        self.num_features = num_features
        self.num_classes = num_classes
        self.bias = bias
        key = jax.random.PRNGKey(0) if key is None else key
        out_dim = num_features * 2 if bias else num_features
        if num_classes is None:
            # nn.Linear(1, out_dim, bias=False): weight is (out_dim, 1); the
            # original init's `[:, :num_features]` covers the whole (out_dim, 1)
            # tensor and `[:, num_features:]` is empty, so the entire weight is
            # ~ N(1, 0.02). Stored here as W.T with shape (1, out_dim).
            self.embed_weight = 1.0 + 0.02 * jax.random.normal(
                key, (1, out_dim), dtype=jnp.float32)
        else:
            if bias:
                gamma_w = 1.0 + 0.02 * jax.random.normal(
                    key, (num_classes, num_features), dtype=jnp.float32)
                beta_w = jnp.zeros((num_classes, num_features), dtype=jnp.float32)
                self.embed_weight = jnp.concatenate([gamma_w, beta_w], axis=1)
            else:
                self.embed_weight = 1.0 + 0.02 * jax.random.normal(
                    key, (num_classes, num_features), dtype=jnp.float32)

    def _embed(self, condition):
        if self.num_classes is None:
            # nn.Linear(1, out, bias=False): y = cond @ W.T  (embed_weight = W.T)
            cond = condition.reshape(-1, 1).astype(jnp.float32)
            return cond @ self.embed_weight              # (B, out_dim)
        # nn.Embedding lookup.
        return self.embed_weight[condition.astype(jnp.int32)]

    def __call__(self, x, condition):
        emb = self._embed(condition)
        C = self.num_features
        if self.bias:
            gamma, beta = emb[:, :C], emb[:, C:]
        else:
            gamma = emb
            beta = jnp.zeros_like(gamma)
        return conditional_batchnorm2d_pallas(x, gamma, beta)


def _reference(x, gamma, beta):
    """Pure-JAX reference: training-mode BN (biased var) + per-sample affine."""
    x = x.astype(jnp.float32)
    mean = jnp.mean(x, axis=(0, 2, 3), keepdims=True)
    var = jnp.mean(jnp.square(x - mean), axis=(0, 2, 3), keepdims=True)
    xn = (x - mean) * jax.lax.rsqrt(var + EPS)
    return gamma[:, :, None, None] * xn + beta[:, :, None, None]


if __name__ == "__main__":
    key = jax.random.PRNGKey(0)
    k1, k2, k3, k4, k5, k6, k7, k8 = jax.random.split(key, 8)

    # Test 1: discrete condition (Embedding path), fused single-pass kernel.
    B, C, H, W = 2, 4, 16, 16
    num_classes = 8
    x = jax.random.normal(k1, (B, C, H, W), dtype=jnp.float32)
    cond = jax.random.randint(k2, (B,), 0, num_classes)
    mod = ConditionalBatchNorm2dJAX(C, num_classes=num_classes, bias=True, key=k3)
    out = jax.block_until_ready(mod(x, cond))
    emb = mod.embed_weight[cond]
    ref = _reference(x, emb[:, :C], emb[:, C:])
    assert out.shape == (B, C, H, W)
    assert jnp.allclose(out, ref, atol=1e-4, rtol=1e-4), \
        float(jnp.max(jnp.abs(out - ref)))

    # Test 2: continuous sigma condition (Linear path), non-lane-aligned
    # spatial extent (H*W = 49 handled as a full-dim block, no padding).
    B2, C2, H2, W2 = 3, 6, 7, 7
    x2 = jax.random.normal(k4, (B2, C2, H2, W2), dtype=jnp.float32)
    sigma = jax.random.uniform(k5, (B2, 1), dtype=jnp.float32)
    mod2 = ConditionalBatchNorm2dJAX(C2, num_classes=None, bias=True, key=k3)
    out2 = jax.block_until_ready(mod2(x2, sigma))
    emb2 = sigma.reshape(-1, 1) @ mod2.embed_weight
    ref2 = _reference(x2, emb2[:, :C2], emb2[:, C2:])
    assert out2.shape == (B2, C2, H2, W2)
    assert jnp.allclose(out2, ref2, atol=1e-4, rtol=1e-4), \
        float(jnp.max(jnp.abs(out2 - ref2)))

    # Test 3: force the tiled two-pass streaming path with a ragged spatial
    # tail (HW = 200, THW = 128 -> masked stats tail, dropped OOB writes) and
    # a batch size that is not a power of two (TB = 1 divides B = 3).
    B3, C3, H3, W3 = 3, 8, 10, 20
    x3 = 2.0 * jax.random.normal(k6, (B3, C3, H3, W3), dtype=jnp.float32) + 0.5
    g3 = 1.0 + 0.1 * jax.random.normal(k7, (B3, C3), dtype=jnp.float32)
    b3 = 0.1 * jax.random.normal(k8, (B3, C3), dtype=jnp.float32)
    out3 = jax.block_until_ready(
        conditional_batchnorm2d_pallas(x3, g3, b3, force_two_pass=True,
                                       _force_tiles=(1, 128)))
    ref3 = _reference(x3, g3, b3)
    assert out3.shape == (B3, C3, H3, W3)
    assert jnp.allclose(out3, ref3, atol=1e-4, rtol=1e-4), \
        float(jnp.max(jnp.abs(out3 - ref3)))

    print("KERNEL_OK")
</pallas_src>

<mosaic_0001>
module attributes {stable_mosaic.version = 11 : i64} {
  func.func @kernel(%arg0: i32, %arg1: memref<2x4x256xf32, #tpu.memory_space<vmem>>, %arg2: memref<2x4x1xf32, #tpu.memory_space<vmem>>, %arg3: memref<2x4x1xf32, #tpu.memory_space<vmem>>, %arg4: memref<2x4x256xf32, #tpu.memory_space<vmem>>) attributes {dimension_semantics = [#tpu.dimension_semantics<arbitrary>], iteration_bounds = array<i64: 1>, scalar_prefetch = 0 : i64, scratch_operands = 0 : i64, tpu.core_type = #tpu.core_type<tc>, window_params = [{pipeline_mode = #tpu.pipeline_mode<synchronous>, transform_indices = @transform_0, window_bounds = array<i64: 2, 4, 256>}, {pipeline_mode = #tpu.pipeline_mode<synchronous>, transform_indices = @transform_1, window_bounds = array<i64: 2, 4, 1>}, {pipeline_mode = #tpu.pipeline_mode<synchronous>, transform_indices = @transform_2, window_bounds = array<i64: 2, 4, 1>}, {pipeline_mode = #tpu.pipeline_mode<synchronous>, transform_indices = @transform_3, window_bounds = array<i64: 2, 4, 256>}]} {
    %c0 = arith.constant 0 : index
    %c0_0 = arith.constant 0 : index
    %c0_1 = arith.constant 0 : index
    %0 = vector.load %arg1[%c0, %c0_0, %c0_1] : memref<2x4x256xf32, #tpu.memory_space<vmem>>, vector<2x4x256xf32>
    %cst = arith.constant dense<0.000000e+00> : vector<4xf32>
    %1 = vector.multi_reduction <add>, %0, %cst [0, 2] : vector<2x4x256xf32> to vector<4xf32>
    %2 = vector.shape_cast %1 : vector<4xf32> to vector<1x4x1xf32>
    %cst_2 = arith.constant 0.001953125 : f32
    %3 = vector.broadcast %cst_2 : f32 to vector<1x4x1xf32>
    %4 = arith.mulf %2, %3 : vector<1x4x1xf32>
    %5 = arith.mulf %0, %0 : vector<2x4x256xf32>
    %cst_3 = arith.constant dense<0.000000e+00> : vector<4xf32>
    %6 = vector.multi_reduction <add>, %5, %cst_3 [0, 2] : vector<2x4x256xf32> to vector<4xf32>
    %7 = vector.shape_cast %6 : vector<4xf32> to vector<1x4x1xf32>
    %cst_4 = arith.constant 0.001953125 : f32
    %8 = vector.broadcast %cst_4 : f32 to vector<1x4x1xf32>
    %9 = arith.mulf %7, %8 : vector<1x4x1xf32>
    %10 = arith.mulf %4, %4 : vector<1x4x1xf32>
    %11 = arith.subf %9, %10 : vector<1x4x1xf32>
    %cst_5 = arith.constant 0.000000e+00 : f32
    %12 = vector.broadcast %cst_5 : f32 to vector<1x4x1xf32>
    %13 = arith.maximumf %11, %12 : vector<1x4x1xf32>
    %cst_6 = arith.constant 9.99999974E-6 : f32
    %14 = vector.broadcast %cst_6 : f32 to vector<1x4x1xf32>
    %15 = arith.addf %13, %14 : vector<1x4x1xf32>
    %16 = math.rsqrt %15 : vector<1x4x1xf32>
    %c0_7 = arith.constant 0 : index
    %c0_8 = arith.constant 0 : index
    %c0_9 = arith.constant 0 : index
    %17 = vector.load %arg2[%c0_7, %c0_8, %c0_9] : memref<2x4x1xf32, #tpu.memory_space<vmem>>, vector<2x4x1xf32>
    %18 = vector.broadcast %16 : vector<1x4x1xf32> to vector<2x4x1xf32>
    %19 = arith.mulf %17, %18 : vector<2x4x1xf32>
    %c0_10 = arith.constant 0 : index
    %c0_11 = arith.constant 0 : index
    %c0_12 = arith.constant 0 : index
    %20 = vector.load %arg3[%c0_10, %c0_11, %c0_12] : memref<2x4x1xf32, #tpu.memory_space<vmem>>, vector<2x4x1xf32>
    %21 = vector.broadcast %4 : vector<1x4x1xf32> to vector<2x4x1xf32>
    %22 = arith.mulf %21, %19 : vector<2x4x1xf32>
    %23 = arith.subf %20, %22 : vector<2x4x1xf32>
    %24 = vector.broadcast %19 : vector<2x4x1xf32> to vector<2x4x256xf32>
    %25 = arith.mulf %0, %24 : vector<2x4x256xf32>
    %26 = vector.broadcast %23 : vector<2x4x1xf32> to vector<2x4x256xf32>
    %27 = arith.addf %25, %26 : vector<2x4x256xf32>
    %c0_13 = arith.constant 0 : index
    %c0_14 = arith.constant 0 : index
    %c0_15 = arith.constant 0 : index
    %28 = vector.load %arg4[%c0_13, %c0_14, %c0_15] : memref<2x4x256xf32, #tpu.memory_space<vmem>>, vector<2x4x256xf32>
    tpu.vector_store %arg4[%c0_13, %c0_14, %c0_15], %27 {strides = array<i32>} : memref<2x4x256xf32, #tpu.memory_space<vmem>>, vector<2x4x256xf32>,
    return
  }
  func.func @transform_0(%arg0: i32) -> (i32, i32, i32) {
    %c0_i32 = arith.constant 0 : i32
    %c0_i32_0 = arith.constant 0 : i32
    %c0_i32_1 = arith.constant 0 : i32
    %c0_i32_2 = arith.constant 0 : i32
    return %c0_i32, %c0_i32_0, %c0_i32_1 : i32, i32, i32
  }
  func.func @transform_1(%arg0: i32) -> (i32, i32, i32) {
    %c0_i32 = arith.constant 0 : i32
    %c0_i32_0 = arith.constant 0 : i32
    %c0_i32_1 = arith.constant 0 : i32
    %c0_i32_2 = arith.constant 0 : i32
    return %c0_i32, %c0_i32_0, %c0_i32_1 : i32, i32, i32
  }
  func.func @transform_2(%arg0: i32) -> (i32, i32, i32) {
    %c0_i32 = arith.constant 0 : i32
    %c0_i32_0 = arith.constant 0 : i32
    %c0_i32_1 = arith.constant 0 : i32
    %c0_i32_2 = arith.constant 0 : i32
    return %c0_i32, %c0_i32_0, %c0_i32_1 : i32, i32, i32
  }
  func.func @transform_3(%arg0: i32) -> (i32, i32, i32) {
    %c0_i32 = arith.constant 0 : i32
    %c0_i32_0 = arith.constant 0 : i32
    %c0_i32_1 = arith.constant 0 : i32
    %c0_i32_2 = arith.constant 0 : i32
    return %c0_i32, %c0_i32_0, %c0_i32_1 : i32, i32, i32
  }
}

</mosaic_0001>

<bundles_post_ra>
// kernel: _conditional_batchnorm2d_pallas.1
= control target key start
LH: loop header
LB: loop body
LE: loop exit
PB: predicated region body
PF: predicated region fallthrough
CT: control target
= control target key end

     0   :  { %vm22_vm0 = vcmask 1043456   ;;  %v132_v22 = vmov 0   ;;  %v133_v42 = vmov 839922192   ;;  %v77_v44 = vlaneseq  ;;  %s202_s0 = inlined_call_operand.vmem [shape: f32[2,4,256], index: 0, kind: input, shape index: {}]   ;;  %s203_s1 = inlined_call_operand.vmem [shape: f32[2,4,1], index: 1, kind: input, shape index: {}]   ;;  %s204_s2 = inlined_call_operand.vmem [shape: f32[2,4,1], index: 2, kind: input, shape index: {}]   ;;  %s205_s3 = inlined_call_operand.vmem [shape: f32[2,4,256], index: 3, kind: output, shape index: {}]  }
   0x1   :  { %v157_v0 = vld [vmem:[%s202_s0] sm:$0xff]  ;;  %v162_v1 = vld [vmem:[%s202_s0 + $0x8] sm:$0xff]  ;;  %126 = vset.pattern.permute.xlu1 %v132_v22  ;;  %127 = vset.pattern.permute.xlu0 %v132_v22  ;;  %v75_v43 = vunpack.c.l.s4 %v133_v42 }
   0x2   :  { %v18_v2 = vcombine.high %v157_v0, %v157_v0  ;;  %v19_v3 = vcombine.high %v162_v1, %v162_v1  ;;  %v23_v4 = vsel %vm22_vm0, %v157_v0, 0.0  ;;  %v33_v5 = vmul.f32 %v157_v0, %v157_v0  ;;  %v56_v31 = vld [vmem:[%s203_s1] sm:$0xf]  ;;  %v57_v32 = vld [vmem:[%s203_s1 + $0x4] sm:$0xf] }
   0x3   :  { %v34_v6 = vmul.f32 %v162_v1, %v162_v1  ;;  %v26_v8 = vsel %vm22_vm0, %v162_v1, 0.0  ;;  %v60_v36 = vld [vmem:[%s204_s2] sm:$0xf]  ;;  %v61_v40 = vld [vmem:[%s204_s2 + $0x4] sm:$0xf]  ;;  %v76_v45 = vunpack.c.0.s8 %v75_v43  ;;  %v78_v46 = vshrl.u32 %v77_v44, 7 }
   0x4   :  { %v24_v7 = vsel %vm22_vm0, %v18_v2, 0.0  ;;  %v37_v10 = vcombine.high %v33_v5, %v33_v5  ;;  %v41_v12 = vsel %vm22_vm0, %v33_v5, 0.0  ;;  %v28_v13 = vsel %vm22_vm0, %v19_v3, 0.0 }
   0x5   :  { %v25_v9 = vadd.f32 %v24_v7, %v23_v4  ;;  %v38_v11 = vcombine.high %v34_v6, %v34_v6  ;;  %v44_v16 = vsel %vm22_vm0, %v34_v6, 0.0  ;;  %v79_v47 = vsub.s32 %v76_v45, %v78_v46 }
   0x6   :  { %v42_v15 = vsel %vm22_vm0, %v37_v10, 0.0 }
   0x7   :  { %v27_v14 = vadd.f32 %v26_v8, %v25_v9  ;;  %v43_v17 = vadd.f32 %v42_v15, %v41_v12  ;;  %v46_v19 = vsel %vm22_vm0, %v38_v11, 0.0 }
   0x9   :  { %v29_v18 = vadd.f32 %v28_v13, %v27_v14  ;;  %v45_v20 = vadd.f32 %v44_v16, %v43_v17 }
   0xb   :  { %30 = vadd.xlane.f32.xlu0 %v29_v18  ;;  %v47_v21 = vadd.f32 %v46_v19, %v45_v20 }
   0xf   :  { %48 = vadd.xlane.f32.xlu0 %v47_v21 }
  0x94   :  { %v31_v23 = vpop.xlane.xlu0 %30 }
  0x95   :  { %v32_v24 = vmul.f32 0.001953125, %v31_v23 }
  0x97   :  { %v51_v26 = vmul.f32 %v32_v24, %v32_v24 }
  0x98   :  { %v49_v25 = vpop.xlane.xlu0 %48 }
  0x99   :  { %v50_v27 = vmul.f32 0.001953125, %v49_v25 }
  0x9b   :  { %v52_v28 = vsub.f32 %v50_v27, %v51_v26 }
  0x9d   :  { %v53_v29 = vmax.f32 %v52_v28, 0.0 }
  0x9f   :  { %v54_v30 = vadd.f32 1e-05, %v53_v29 }
  0xa1   :  { %130 = vrsqrt.f32 %v54_v30 }
  0xae   :  { %v131_v33 = vpop.eup %130 }
  0xaf   :  { %v58_v34 = vmul.f32 %v131_v33, %v56_v31  ;;  %v59_v35 = vmul.f32 %v131_v33, %v57_v32 }
  0xb1   :  { %68 = vperm.xlu1 %126, %v58_v34   ;;  %v62_v37 = vmul.f32 %v58_v34, %v32_v24  ;;  %v63_v39 = vmul.f32 %v59_v35, %v32_v24 }
  0xb3   :  { %v64_v38 = vsub.f32 %v60_v36, %v62_v37  ;;  %v65_v41 = vsub.f32 %v61_v40, %v63_v39 }
  0xb5   :  { %72 = vperm.xlu1 %126, %v59_v35   ;;  %94 = vperm.xlu0 %127, %v64_v38  }
  0xb9   :  { %98 = vperm.xlu1 %126, %v65_v41  }
 0x12c   :  { %v69_v48 = vpop.permute.xlu1 %68 }
 0x12d   :  { %v80_v49 = vrot.slane %v69_v48, %v79_v47 }
 0x12f   :  { %v90_v52 = vmul.f32 %v80_v49, %v157_v0 }
 0x130   :  { %v73_v50 = vpop.permute.xlu1 %72  ;;  %v95_v51 = vpop.permute.xlu0 %94 }
 0x131   :  { %v87_v53 = vrot.slane %v73_v50, %v79_v47  ;;  %v106_v54 = vrot.slane %v95_v51, %v79_v47 }
 0x133   :  { %v116_v55 = vadd.f32 %v106_v54, %v90_v52  ;;  %v91_v57 = vmul.f32 %v87_v53, %v162_v1 }
 0x134   :  { %v99_v56 = vpop.permute.xlu1 %98 }
 0x135   :  { %118 = vst [vmem:[%s205_s3] sm:$0xff] %v116_v55  ;;  %v113_v58 = vrot.slane %v99_v56, %v79_v47 }
 0x137   :  { %v117_v59 = vadd.f32 %v113_v58, %v91_v57 }
 0x139   :  { %119 = vst [vmem:[%s205_s3 + $0x8] sm:$0xff] %v117_v59 }

</bundles_post_ra>
